<compile_context>
chip_gen: v6e
topology: v6e:2x2x1
jax: 0.10.0
libtpu: 0.0.40
codegen_flags: <defaults>
</compile_context>

<pallas_src>
import jax
import jax.numpy as jnp
from jax.experimental import pallas as pl
from jax.experimental.pallas import tpu as pltpu

_LANE = 128      # lane width (last-dim tiling)
_SUBLANE = 8     # sublane width (second-to-last-dim tiling)


def _cdiv(a, b):
    return (a + b - 1) // b


def _round_up(x, m):
    return _cdiv(x, m) * m


def _softplus(x):
    # Matches torch.nn.Softplus (beta=1, threshold=20): x > 20 -> x,
    # else log1p(exp(x)). Clamp the exp argument to avoid overflow.
    return jnp.where(x > 20.0, x, jnp.log1p(jnp.exp(jnp.minimum(x, 20.0))))


def _mlp_kernel(x_ref, w1_ref, b1_ref, w2_ref, b2_ref, w3_ref, b3_ref, o_ref):
    """Fused 3-layer MLP on one batch tile; all matmuls accumulate in f32."""
    x = x_ref[...]
    h = jnp.dot(x, w1_ref[...], preferred_element_type=jnp.float32) + b1_ref[...]
    h = _softplus(h)                       # f32 on VPU/EUP (v5e has no bf16 VPU)
    h = h.astype(w2_ref.dtype)             # bf16 cast only if weights are bf16
    h = jnp.dot(h, w2_ref[...], preferred_element_type=jnp.float32) + b2_ref[...]
    h = _softplus(h)
    h = h.astype(w3_ref.dtype)
    out = jnp.dot(h, w3_ref[...], preferred_element_type=jnp.float32) + b3_ref[...]
    o_ref[...] = out.astype(o_ref.dtype)


def prepare_params(params, *, compute_dtype=jnp.bfloat16):
    """Zero-pad the matmul *output* dims (d_theta, output_units) to multiples of
    128 so outputs stay lane-dense; the K dim (input_units) is left unpadded
    (MXU pads K internally at zero DMA cost). Weights are cast to compute_dtype
    (bf16 recommended on all generations); biases stay f32."""
    w1, b1 = params["w1"], params["b1"]
    w2, b2 = params["w2"], params["b2"]
    w3, b3 = params["w3"], params["b3"]
    in_u, d_theta = w1.shape
    out_u = w3.shape[1]
    d_p = _round_up(d_theta, _LANE)
    out_p = _round_up(out_u, _LANE)

    def pad2(a, rows, cols):
        return jnp.pad(a, ((0, rows - a.shape[0]), (0, cols - a.shape[1])))

    padded = {
        "w1": pad2(w1, in_u, d_p).astype(compute_dtype),   # K stays unpadded
        "b1": pad2(b1, 1, d_p).astype(jnp.float32),
        # Invariant: padded rows of w2/w3 must stay zero so the spurious
        # softplus(0) activations in padded hidden columns contribute nothing.
        "w2": pad2(w2, d_p, d_p).astype(compute_dtype),
        "b2": pad2(b2, 1, d_p).astype(jnp.float32),
        "w3": pad2(w3, d_p, out_p).astype(compute_dtype),
        "b3": pad2(b3, 1, out_p).astype(jnp.float32),
    }
    dims = {"in_u": in_u, "d_theta": d_theta, "out_u": out_u,
            "d_p": d_p, "out_p": out_p}
    return padded, dims


def _vmem_limit_bytes():
    """Generation-aware VMEM limit: ~80% of physical VMEM (v5e/v6e 128 MiB,
    v7x 64 MiB), leaving headroom for Mosaic internal scratch."""
    try:
        cap = pltpu.get_tpu_info().vmem_capacity_bytes
        return int(cap * 0.8)
    except Exception:
        return 48 * 1024 * 1024  # conservative fallback (safe even on v7x)


def inference_block_forward(x, padded_params, dims, *, block_m=256,
                            min_batch_tiles=1, out_dtype=jnp.float32):
    """x: [B, input_units]. padded_params/dims from prepare_params().

    min_batch_tiles: set to 2 on v7x MXU-bound mid-size batches so the
    "parallel" batch axis shards across both TensorCores (skip when the
    workload is weight-DMA-bound: tiny batch, large d_theta)."""
    p = padded_params
    B, in_u = x.shape
    assert in_u == dims["in_u"], "input feature mismatch"
    d_p, out_p, out_u = dims["d_p"], dims["out_p"], dims["out_u"]
    compute_dtype = p["w1"].dtype

    # Adaptive batch tiling: split B into cdiv(B, block_m) tiles and round each
    # tile only up to a sublane multiple -> no over-padding to block_m multiples.
    num_tiles = max(1, _cdiv(B, block_m))
    if min_batch_tiles > 1 and B >= _SUBLANE * min_batch_tiles:
        num_tiles = max(num_tiles, min_batch_tiles)
    bm = _round_up(_cdiv(B, num_tiles), _SUBLANE)
    b_pad = bm * num_tiles

    x = x.astype(compute_dtype)
    if b_pad != B:
        x_p = jnp.pad(x, ((0, b_pad - B), (0, 0)))
    else:
        x_p = x  # skip the wrapper-side pad copy when no padding is needed

    # With tiny per-tile MXU work the kernel is x-DMA / per-step-overhead bound:
    # buffer the x stream deeper.
    x_buffers = 3 if (num_tiles >= 4 and d_p <= 256) else 2

    flops = 2 * b_pad * (in_u * d_p + d_p * d_p + d_p * out_p)
    transcendentals = 4 * b_pad * d_p          # exp + log1p per softplus elem
    bytes_accessed = (
        int(x_p.size) * x_p.dtype.itemsize
        + sum(int(v.size) * v.dtype.itemsize for v in p.values())
        + b_pad * out_p * jnp.dtype(out_dtype).itemsize)
    cost = pl.CostEstimate(flops=flops, transcendentals=transcendentals,
                           bytes_accessed=bytes_accessed)

    def build(use_pipeline_modes):
        def wspec(shape):
            if use_pipeline_modes:
                # Constant index_map -> DMA'd once and resident; single-buffer so
                # resident weights don't pay a 2x VMEM footprint.
                return pl.BlockSpec(shape, lambda i: (0, 0),
                                    pipeline_mode=pl.Buffered(1))
            return pl.BlockSpec(shape, lambda i: (0, 0))

        if use_pipeline_modes and x_buffers != 2:
            x_spec = pl.BlockSpec((bm, in_u), lambda i: (i, 0),
                                  pipeline_mode=pl.Buffered(x_buffers))
        else:
            x_spec = pl.BlockSpec((bm, in_u), lambda i: (i, 0))

        return pl.pallas_call(
            _mlp_kernel,
            out_shape=jax.ShapeDtypeStruct((b_pad, out_p), out_dtype),
            grid_spec=pltpu.PrefetchScalarGridSpec(
                num_scalar_prefetch=0,
                grid=(num_tiles,),
                in_specs=[
                    x_spec,                       # x tile (K unpadded)
                    wspec((in_u, d_p)),           # w1 (resident)
                    wspec((1, d_p)),              # b1
                    wspec((d_p, d_p)),            # w2 (resident)
                    wspec((1, d_p)),              # b2
                    wspec((d_p, out_p)),          # w3 (resident)
                    wspec((1, out_p)),            # b3
                ],
                out_specs=pl.BlockSpec((bm, out_p), lambda i: (i, 0)),
            ),
            compiler_params=pltpu.CompilerParams(
                dimension_semantics=("parallel",),
                vmem_limit_bytes=_vmem_limit_bytes(),
            ),
            cost_estimate=cost,
        )

    args = (x_p, p["w1"], p["b1"], p["w2"], p["b2"], p["w3"], p["b3"])
    # TODO(synk): for very large d_theta where resident weights exceed VMEM even
    # with bf16 + Buffered(1), add a trailing "arbitrary" K grid axis tiling
    # w2/w3 and accumulate into a VMEM scratch (pl.when init / last-k writeback).
    # TODO(synk): optional fp8 storage for w2 (dominant bytes) on v7x, gated
    # behind an accuracy flag.
    try:
        out_padded = build(True)(*args)
    except Exception:
        # Fallback for jax versions without BlockSpec pipeline_mode support.
        out_padded = build(False)(*args)

    return out_padded[:B, :out_u]


def init_params(key, input_units, d_theta, output_units):
    """Deterministic synthetic init (nn.Linear-like uniform)."""
    ks = jax.random.split(key, 6)

    def linear_init(kw, kb, fan_in, fan_out):
        bound = 1.0 / jnp.sqrt(jnp.float32(fan_in))
        # stored as [in, out] (transposed vs PyTorch's [out, in])
        w = jax.random.uniform(kw, (fan_in, fan_out), jnp.float32, -bound, bound)
        b = jax.random.uniform(kb, (1, fan_out), jnp.float32, -bound, bound)
        return w, b

    w1, b1 = linear_init(ks[0], ks[1], input_units, d_theta)
    w2, b2 = linear_init(ks[2], ks[3], d_theta, d_theta)
    w3, b3 = linear_init(ks[4], ks[5], d_theta, output_units)
    return {"w1": w1, "b1": b1, "w2": w2, "b2": b2, "w3": w3, "b3": b3}


def reference_forward(x, p):
    h1 = _softplus(x @ p["w1"] + p["b1"])
    h2 = _softplus(h1 @ p["w2"] + p["b2"])
    return h2 @ p["w3"] + p["b3"]


if __name__ == "__main__":
    key = jax.random.PRNGKey(0)
    k_param, k_x = jax.random.split(key)

    input_units, d_theta, output_units = 32, 32, 16
    batch = 20   # deliberately not a multiple of 8 to exercise batch padding

    params = init_params(k_param, input_units, d_theta, output_units)
    x = jax.random.normal(k_x, (batch, input_units), jnp.float32)
    ref = reference_forward(x, params)

    # 1) f32 compute: tight correctness check against the pure-JAX reference.
    pp_f32, dims_f32 = prepare_params(params, compute_dtype=jnp.float32)
    out_f32 = inference_block_forward(x, pp_f32, dims_f32, block_m=256)
    out_f32 = jax.block_until_ready(out_f32)
    assert out_f32.shape == (batch, output_units)
    assert jnp.allclose(out_f32, ref, atol=1e-5, rtol=1e-5), "f32 mismatch"

    # 2) bf16 compute (production config: bf16 weights/activations, f32
    #    accumulation + f32 softplus): looser tolerance scaled for bf16.
    pp_bf16, dims_bf16 = prepare_params(params, compute_dtype=jnp.bfloat16)
    out_bf16 = inference_block_forward(x, pp_bf16, dims_bf16, block_m=256)
    out_bf16 = jax.block_until_ready(out_bf16)
    assert out_bf16.shape == (batch, output_units)
    assert jnp.allclose(out_bf16, ref, atol=5e-2, rtol=5e-2), "bf16 mismatch"

    print("KERNEL_OK")
</pallas_src>

<mosaic_0001>
module attributes {stable_mosaic.version = 11 : i64} {
  func.func @_mlp_kernel(%arg0: i32, %arg1: memref<24x32xf32, #tpu.memory_space<vmem>>, %arg2: memref<32x128xf32, #tpu.memory_space<vmem>>, %arg3: memref<1x128xf32, #tpu.memory_space<vmem>>, %arg4: memref<128x128xf32, #tpu.memory_space<vmem>>, %arg5: memref<1x128xf32, #tpu.memory_space<vmem>>, %arg6: memref<128x128xf32, #tpu.memory_space<vmem>>, %arg7: memref<1x128xf32, #tpu.memory_space<vmem>>, %arg8: memref<24x128xf32, #tpu.memory_space<vmem>>) attributes {dimension_semantics = [#tpu.dimension_semantics<parallel>], iteration_bounds = array<i64: 1>, scalar_prefetch = 0 : i64, scratch_operands = 0 : i64, tpu.core_type = #tpu.core_type<tc>, window_params = [{transform_indices = @transform_0, window_bounds = array<i64: 24, 32>}, {pipeline_mode = #tpu.pipeline_mode<synchronous>, transform_indices = @transform_1, window_bounds = array<i64: 32, 128>}, {pipeline_mode = #tpu.pipeline_mode<synchronous>, transform_indices = @transform_2, window_bounds = array<i64: 1, 128>}, {pipeline_mode = #tpu.pipeline_mode<synchronous>, transform_indices = @transform_3, window_bounds = array<i64: 128, 128>}, {pipeline_mode = #tpu.pipeline_mode<synchronous>, transform_indices = @transform_4, window_bounds = array<i64: 1, 128>}, {pipeline_mode = #tpu.pipeline_mode<synchronous>, transform_indices = @transform_5, window_bounds = array<i64: 128, 128>}, {pipeline_mode = #tpu.pipeline_mode<synchronous>, transform_indices = @transform_6, window_bounds = array<i64: 1, 128>}, {transform_indices = @transform_7, window_bounds = array<i64: 24, 128>}]} {
    %c0 = arith.constant 0 : index
    %c0_0 = arith.constant 0 : index
    %0 = vector.load %arg1[%c0, %c0_0] : memref<24x32xf32, #tpu.memory_space<vmem>>, vector<24x32xf32>
    %c0_1 = arith.constant 0 : index
    %c0_2 = arith.constant 0 : index
    %1 = vector.load %arg2[%c0_1, %c0_2] : memref<32x128xf32, #tpu.memory_space<vmem>>, vector<32x128xf32>
    %cst = arith.constant dense<0.000000e+00> : vector<24x128xf32>
    %2 = tpu.matmul %0, %1, %cst {dimension_numbers = #tpu.dot_dimension_numbers<[1], [0], [0], [1], [0, 0, 1, 1], [], []>} : vector<24x32xf32>, vector<32x128xf32>, vector<24x128xf32> -> vector<24x128xf32>
    %c0_3 = arith.constant 0 : index
    %c0_4 = arith.constant 0 : index
    %3 = vector.load %arg3[%c0_3, %c0_4] : memref<1x128xf32, #tpu.memory_space<vmem>>, vector<1x128xf32>
    %4 = vector.broadcast %3 : vector<1x128xf32> to vector<24x128xf32>
    %5 = arith.addf %2, %4 : vector<24x128xf32>
    %cst_5 = arith.constant 2.000000e+01 : f32
    %6 = vector.broadcast %cst_5 : f32 to vector<24x128xf32>
    %7 = arith.cmpf ogt, %5, %6 : vector<24x128xf32>
    %cst_6 = arith.constant 2.000000e+01 : f32
    %8 = vector.broadcast %cst_6 : f32 to vector<24x128xf32>
    %9 = arith.minimumf %5, %8 : vector<24x128xf32>
    %10 = math.exp %9 : vector<24x128xf32>
    %11 = math.log1p %10 : vector<24x128xf32>
    %12 = arith.select %7, %5, %11 : vector<24x128xi1>, vector<24x128xf32>
    %c0_7 = arith.constant 0 : index
    %c0_8 = arith.constant 0 : index
    %13 = vector.load %arg4[%c0_7, %c0_8] : memref<128x128xf32, #tpu.memory_space<vmem>>, vector<128x128xf32>
    %cst_9 = arith.constant dense<0.000000e+00> : vector<24x128xf32>
    %14 = tpu.matmul %12, %13, %cst_9 {dimension_numbers = #tpu.dot_dimension_numbers<[1], [0], [0], [1], [0, 0, 1, 1], [], []>} : vector<24x128xf32>, vector<128x128xf32>, vector<24x128xf32> -> vector<24x128xf32>
    %c0_10 = arith.constant 0 : index
    %c0_11 = arith.constant 0 : index
    %15 = vector.load %arg5[%c0_10, %c0_11] : memref<1x128xf32, #tpu.memory_space<vmem>>, vector<1x128xf32>
    %16 = vector.broadcast %15 : vector<1x128xf32> to vector<24x128xf32>
    %17 = arith.addf %14, %16 : vector<24x128xf32>
    %cst_12 = arith.constant 2.000000e+01 : f32
    %18 = vector.broadcast %cst_12 : f32 to vector<24x128xf32>
    %19 = arith.cmpf ogt, %17, %18 : vector<24x128xf32>
    %cst_13 = arith.constant 2.000000e+01 : f32
    %20 = vector.broadcast %cst_13 : f32 to vector<24x128xf32>
    %21 = arith.minimumf %17, %20 : vector<24x128xf32>
    %22 = math.exp %21 : vector<24x128xf32>
    %23 = math.log1p %22 : vector<24x128xf32>
    %24 = arith.select %19, %17, %23 : vector<24x128xi1>, vector<24x128xf32>
    %c0_14 = arith.constant 0 : index
    %c0_15 = arith.constant 0 : index
    %25 = vector.load %arg6[%c0_14, %c0_15] : memref<128x128xf32, #tpu.memory_space<vmem>>, vector<128x128xf32>
    %cst_16 = arith.constant dense<0.000000e+00> : vector<24x128xf32>
    %26 = tpu.matmul %24, %25, %cst_16 {dimension_numbers = #tpu.dot_dimension_numbers<[1], [0], [0], [1], [0, 0, 1, 1], [], []>} : vector<24x128xf32>, vector<128x128xf32>, vector<24x128xf32> -> vector<24x128xf32>
    %c0_17 = arith.constant 0 : index
    %c0_18 = arith.constant 0 : index
    %27 = vector.load %arg7[%c0_17, %c0_18] : memref<1x128xf32, #tpu.memory_space<vmem>>, vector<1x128xf32>
    %28 = vector.broadcast %27 : vector<1x128xf32> to vector<24x128xf32>
    %29 = arith.addf %26, %28 : vector<24x128xf32>
    %c0_19 = arith.constant 0 : index
    %c0_20 = arith.constant 0 : index
    %30 = vector.load %arg8[%c0_19, %c0_20] : memref<24x128xf32, #tpu.memory_space<vmem>>, vector<24x128xf32>
    tpu.vector_store %arg8[%c0_19, %c0_20], %29 {strides = array<i32>} : memref<24x128xf32, #tpu.memory_space<vmem>>, vector<24x128xf32>,
    return
  }
  func.func @transform_0(%arg0: i32) -> (i32, i32) {
    %c0_i32 = arith.constant 0 : i32
    %c0_i32_0 = arith.constant 0 : i32
    return %arg0, %c0_i32 : i32, i32
  }
  func.func @transform_1(%arg0: i32) -> (i32, i32) {
    %c0_i32 = arith.constant 0 : i32
    %c0_i32_0 = arith.constant 0 : i32
    %c0_i32_1 = arith.constant 0 : i32
    return %c0_i32, %c0_i32_0 : i32, i32
  }
  func.func @transform_2(%arg0: i32) -> (i32, i32) {
    %c0_i32 = arith.constant 0 : i32
    %c0_i32_0 = arith.constant 0 : i32
    %c0_i32_1 = arith.constant 0 : i32
    return %c0_i32, %c0_i32_0 : i32, i32
  }
  func.func @transform_3(%arg0: i32) -> (i32, i32) {
    %c0_i32 = arith.constant 0 : i32
    %c0_i32_0 = arith.constant 0 : i32
    %c0_i32_1 = arith.constant 0 : i32
    return %c0_i32, %c0_i32_0 : i32, i32
  }
  func.func @transform_4(%arg0: i32) -> (i32, i32) {
    %c0_i32 = arith.constant 0 : i32
    %c0_i32_0 = arith.constant 0 : i32
    %c0_i32_1 = arith.constant 0 : i32
    return %c0_i32, %c0_i32_0 : i32, i32
  }
  func.func @transform_5(%arg0: i32) -> (i32, i32) {
    %c0_i32 = arith.constant 0 : i32
    %c0_i32_0 = arith.constant 0 : i32
    %c0_i32_1 = arith.constant 0 : i32
    return %c0_i32, %c0_i32_0 : i32, i32
  }
  func.func @transform_6(%arg0: i32) -> (i32, i32) {
    %c0_i32 = arith.constant 0 : i32
    %c0_i32_0 = arith.constant 0 : i32
    %c0_i32_1 = arith.constant 0 : i32
    return %c0_i32, %c0_i32_0 : i32, i32
  }
  func.func @transform_7(%arg0: i32) -> (i32, i32) {
    %c0_i32 = arith.constant 0 : i32
    %c0_i32_0 = arith.constant 0 : i32
    return %arg0, %c0_i32 : i32, i32
  }
}

module attributes {stable_mosaic.version = 11 : i64} {
  func.func @_mlp_kernel(%arg0: i32, %arg1: memref<24x32xf32, #tpu.memory_space<vmem>>, %arg2: memref<32x128xf32, #tpu.memory_space<vmem>>, %arg3: memref<1x128xf32, #tpu.memory_space<vmem>>, %arg4: memref<128x128xf32, #tpu.memory_space<vmem>>, %arg5: memref<1x128xf32, #tpu.memory_space<vmem>>, %arg6: memref<128x128xf32, #tpu.memory_space<vmem>>, %arg7: memref<1x128xf32, #tpu.memory_space<vmem>>, %arg8: memref<24x128xf32, #tpu.memory_space<vmem>>) attributes {dimension_semantics = [#tpu.dimension_semantics<parallel>], iteration_bounds = array<i64: 1>, scalar_prefetch = 0 : i64, scratch_operands = 0 : i64, tpu.core_type = #tpu.core_type<tc>, window_params = [{transform_indices = @transform_0, window_bounds = array<i64: 24, 32>}, {pipeline_mode = #tpu.pipeline_mode<synchronous>, transform_indices = @transform_1, window_bounds = array<i64: 32, 128>}, {pipeline_mode = #tpu.pipeline_mode<synchronous>, transform_indices = @transform_2, window_bounds = array<i64: 1, 128>}, {pipeline_mode = #tpu.pipeline_mode<synchronous>, transform_indices = @transform_3, window_bounds = array<i64: 128, 128>}, {pipeline_mode = #tpu.pipeline_mode<synchronous>, transform_indices = @transform_4, window_bounds = array<i64: 1, 128>}, {pipeline_mode = #tpu.pipeline_mode<synchronous>, transform_indices = @transform_5, window_bounds = array<i64: 128, 128>}, {pipeline_mode = #tpu.pipeline_mode<synchronous>, transform_indices = @transform_6, window_bounds = array<i64: 1, 128>}, {transform_indices = @transform_7, window_bounds = array<i64: 24, 128>}]} {
    %c0 = arith.constant 0 : index
    %c0_0 = arith.constant 0 : index
    %0 = vector.load %arg1[%c0, %c0_0] : memref<24x32xf32, #tpu.memory_space<vmem>>, vector<24x32xf32>
    %c0_1 = arith.constant 0 : index
    %c0_2 = arith.constant 0 : index
    %1 = vector.load %arg2[%c0_1, %c0_2] : memref<32x128xf32, #tpu.memory_space<vmem>>, vector<32x128xf32>
    %cst = arith.constant dense<0.000000e+00> : vector<24x128xf32>
    %2 = tpu.matmul %0, %1, %cst {dimension_numbers = #tpu.dot_dimension_numbers<[1], [0], [0], [1], [0, 0, 1, 1], [], []>} : vector<24x32xf32>, vector<32x128xf32>, vector<24x128xf32> -> vector<24x128xf32>
    %c0_3 = arith.constant 0 : index
    %c0_4 = arith.constant 0 : index
    %3 = vector.load %arg3[%c0_3, %c0_4] : memref<1x128xf32, #tpu.memory_space<vmem>>, vector<1x128xf32>
    %4 = vector.broadcast %3 : vector<1x128xf32> to vector<24x128xf32>
    %5 = arith.addf %2, %4 : vector<24x128xf32>
    %cst_5 = arith.constant 2.000000e+01 : f32
    %6 = vector.broadcast %cst_5 : f32 to vector<24x128xf32>
    %7 = arith.cmpf ogt, %5, %6 : vector<24x128xf32>
    %cst_6 = arith.constant 2.000000e+01 : f32
    %8 = vector.broadcast %cst_6 : f32 to vector<24x128xf32>
    %9 = arith.minimumf %5, %8 : vector<24x128xf32>
    %10 = math.exp %9 : vector<24x128xf32>
    %11 = math.log1p %10 : vector<24x128xf32>
    %12 = arith.select %7, %5, %11 : vector<24x128xi1>, vector<24x128xf32>
    %c0_7 = arith.constant 0 : index
    %c0_8 = arith.constant 0 : index
    %13 = vector.load %arg4[%c0_7, %c0_8] : memref<128x128xf32, #tpu.memory_space<vmem>>, vector<128x128xf32>
    %cst_9 = arith.constant dense<0.000000e+00> : vector<24x128xf32>
    %14 = tpu.matmul %12, %13, %cst_9 {dimension_numbers = #tpu.dot_dimension_numbers<[1], [0], [0], [1], [0, 0, 1, 1], [], []>} : vector<24x128xf32>, vector<128x128xf32>, vector<24x128xf32> -> vector<24x128xf32>
    %c0_10 = arith.constant 0 : index
    %c0_11 = arith.constant 0 : index
    %15 = vector.load %arg5[%c0_10, %c0_11] : memref<1x128xf32, #tpu.memory_space<vmem>>, vector<1x128xf32>
    %16 = vector.broadcast %15 : vector<1x128xf32> to vector<24x128xf32>
    %17 = arith.addf %14, %16 : vector<24x128xf32>
    %cst_12 = arith.constant 2.000000e+01 : f32
    %18 = vector.broadcast %cst_12 : f32 to vector<24x128xf32>
    %19 = arith.cmpf ogt, %17, %18 : vector<24x128xf32>
    %cst_13 = arith.constant 2.000000e+01 : f32
    %20 = vector.broadcast %cst_13 : f32 to vector<24x128xf32>
    %21 = arith.minimumf %17, %20 : vector<24x128xf32>
    %22 = math.exp %21 : vector<24x128xf32>
    %23 = math.log1p %22 : vector<24x128xf32>
    %24 = arith.select %19, %17, %23 : vector<24x128xi1>, vector<24x128xf32>
    %c0_14 = arith.constant 0 : index
    %c0_15 = arith.constant 0 : index
    %25 = vector.load %arg6[%c0_14, %c0_15] : memref<128x128xf32, #tpu.memory_space<vmem>>, vector<128x128xf32>
    %cst_16 = arith.constant dense<0.000000e+00> : vector<24x128xf32>
    %26 = tpu.matmul %24, %25, %cst_16 {dimension_numbers = #tpu.dot_dimension_numbers<[1], [0], [0], [1], [0, 0, 1, 1], [], []>} : vector<24x128xf32>, vector<128x128xf32>, vector<24x128xf32> -> vector<24x128xf32>
    %c0_17 = arith.constant 0 : index
    %c0_18 = arith.constant 0 : index
    %27 = vector.load %arg7[%c0_17, %c0_18] : memref<1x128xf32, #tpu.memory_space<vmem>>, vector<1x128xf32>
    %28 = vector.broadcast %27 : vector<1x128xf32> to vector<24x128xf32>
    %29 = arith.addf %26, %28 : vector<24x128xf32>
    %c0_19 = arith.constant 0 : index
    %c0_20 = arith.constant 0 : index
    %30 = vector.load %arg8[%c0_19, %c0_20] : memref<24x128xf32, #tpu.memory_space<vmem>>, vector<24x128xf32>
    tpu.vector_store %arg8[%c0_19, %c0_20], %29 {strides = array<i32>} : memref<24x128xf32, #tpu.memory_space<vmem>>, vector<24x128xf32>,
    return
  }
  func.func @transform_0(%arg0: i32) -> (i32, i32) {
    %c0_i32 = arith.constant 0 : i32
    %c0_i32_0 = arith.constant 0 : i32
    return %arg0, %c0_i32 : i32, i32
  }
  func.func @transform_1(%arg0: i32) -> (i32, i32) {
    %c0_i32 = arith.constant 0 : i32
    %c0_i32_0 = arith.constant 0 : i32
    %c0_i32_1 = arith.constant 0 : i32
    return %c0_i32, %c0_i32_0 : i32, i32
  }
  func.func @transform_2(%arg0: i32) -> (i32, i32) {
    %c0_i32 = arith.constant 0 : i32
    %c0_i32_0 = arith.constant 0 : i32
    %c0_i32_1 = arith.constant 0 : i32
    return %c0_i32, %c0_i32_0 : i32, i32
  }
  func.func @transform_3(%arg0: i32) -> (i32, i32) {
    %c0_i32 = arith.constant 0 : i32
    %c0_i32_0 = arith.constant 0 : i32
    %c0_i32_1 = arith.constant 0 : i32
    return %c0_i32, %c0_i32_0 : i32, i32
  }
  func.func @transform_4(%arg0: i32) -> (i32, i32) {
    %c0_i32 = arith.constant 0 : i32
    %c0_i32_0 = arith.constant 0 : i32
    %c0_i32_1 = arith.constant 0 : i32
    return %c0_i32, %c0_i32_0 : i32, i32
  }
  func.func @transform_5(%arg0: i32) -> (i32, i32) {
    %c0_i32 = arith.constant 0 : i32
    %c0_i32_0 = arith.constant 0 : i32
    %c0_i32_1 = arith.constant 0 : i32
    return %c0_i32, %c0_i32_0 : i32, i32
  }
  func.func @transform_6(%arg0: i32) -> (i32, i32) {
    %c0_i32 = arith.constant 0 : i32
    %c0_i32_0 = arith.constant 0 : i32
    %c0_i32_1 = arith.constant 0 : i32
    return %c0_i32, %c0_i32_0 : i32, i32
  }
  func.func @transform_7(%arg0: i32) -> (i32, i32) {
    %c0_i32 = arith.constant 0 : i32
    %c0_i32_0 = arith.constant 0 : i32
    return %arg0, %c0_i32 : i32, i32
  }
}

</mosaic_0001>

<bundles_post_ra>
// kernel: tpu_custom_call.1
= control target key start
LH: loop header
LB: loop body
LE: loop exit
PB: predicated region body
PF: predicated region fallthrough
CT: control target
= control target key end

     0   :  { %12 = vsyncpa [#allocation3], 0  ;;  %s931_s0 = inlined_call_operand.hbm [shape: f32[24,32], index: 0, kind: input, shape index: {}]   ;;  %s932_s1 = inlined_call_operand.hbm [shape: f32[32,128], index: 1, kind: input, shape index: {}]   ;;  %s933_s2 = inlined_call_operand.vmem [shape: f32[1,128], index: 2, kind: input, shape index: {}]   ;;  %s934_s3 = inlined_call_operand.hbm [shape: f32[128,128], index: 3, kind: input, shape index: {}]   ;;  %s935_s4 = inlined_call_operand.vmem [shape: f32[1,128], index: 4, kind: input, shape index: {}]   ;;  %s936_s5 = inlined_call_operand.hbm [shape: f32[128,128], index: 5, kind: input, shape index: {}]   ;;  %s937_s6 = inlined_call_operand.vmem [shape: f32[1,128], index: 6, kind: input, shape index: {}]   ;;  %s938_s7 = inlined_call_operand.hbm [shape: f32[24,128], index: 7, kind: output, shape index: {}]  }
   0x1   :  { %13 = vsyncpa [#allocation6], 0 }
   0x2   :  { %14 = vsyncpa [#allocation9], 0 }
   0x3   :  { %15 = vsyncpa [#allocation4], 0  ;;  %s789_s24 = smov [#allocation5]   ;;  %s790_s26 = smov [#allocation2]  }
   0x4   :  { %s33_s25 = sshll.u32 %s789_s24, 4  ;;  %s21_s27 = sshll.u32 %s790_s26, 4  ;;  %s34_s25 = int_to_ptr.vmem [resolvable:$true] %s33_s25  ;;  %s22_s27 = int_to_ptr.vmem [resolvable:$true] %s21_s27 }
   0x5   :  { %s689_s28 = scalar_lea.vmem %s34_s25, 512  ;;  %p694_p1 = scmp.lt.s32.totalorder %s34_s25, %s34_s25 }
   0x6   :  { %p690_p0 = scmp.ne.s32.totalorder %s34_s25, %s689_s28  ;;  %p695_p2 = scmp.lt.s32.totalorder %s689_s28, %s689_s28 }
   0x8   :  { %p696_p3 = por %p695_p2, %p694_p1 }
   0xa   :  { %p697_p4 = pnand %p696_p3, %p690_p0 }
   0xc   :  { %700 = shalt.err (!%p697_p4)
}
   0xd   :  { %s791_s29 = smov 128   ;;  %s792_s30 = smov 8  }
   0xe   :  { %39 = dma.hbm_to_vmem [thread:$0]  %s932_s1, 512, %s34_s25, [#allocation6], %s791_s29, %s791_s29, %s792_s30  }
   0xf   :  { %s709_s10 = scalar_lea.vmem %s22_s27, 384  ;;  %p714_p6 = scmp.lt.s32.totalorder %s22_s27, %s22_s27 }
  0x10   :  { %p710_p5 = scmp.ne.s32.totalorder %s22_s27, %s709_s10  ;;  %p715_p7 = scmp.lt.s32.totalorder %s709_s10, %s709_s10 }
  0x12   :  { %p716_p8 = por %p715_p7, %p714_p6 }
  0x14   :  { %p717_p9 = pnand %p716_p8, %p710_p5 }
  0x16   :  { %720 = shalt.err (!%p717_p9)
}
  0x17   :  { %27 = dma.hbm_to_vmem [thread:$0]  %s931_s0, 384, %s22_s27, [#allocation3], %s791_s29, %s791_s29, %s792_s30  }
  0x18   :  { %s793_s13 = smov [#allocation7]   ;;  %s794_s15 = smov [#allocation8]  }
  0x19   :  { %s47_s14 = sshll.u32 %s793_s13, 4  ;;  %s61_s16 = sshll.u32 %s794_s15, 4  ;;  %s48_s14 = int_to_ptr.vmem [resolvable:$true] %s47_s14  ;;  %s62_s16 = int_to_ptr.vmem [resolvable:$true] %s61_s16 }
  0x1a   :  { %s729_s1 = scalar_lea.vmem %s48_s14, 2048  ;;  %p734_p11 = scmp.lt.s32.totalorder %s48_s14, %s48_s14 }
  0x1b   :  { %p730_p10 = scmp.ne.s32.totalorder %s48_s14, %s729_s1  ;;  %p735_p12 = scmp.lt.s32.totalorder %s729_s1, %s729_s1 }
  0x1d   :  { %p736_p13 = por %p735_p12, %p734_p11 }
  0x1f   :  { %p737_p0 = pnand %p736_p13, %p730_p10 }
  0x21   :  { %740 = shalt.err (!%p737_p0)
}
  0x22   :  { %53 = dma.hbm_to_vmem [thread:$0]  %s934_s3, 2048, %s48_s14, [#allocation6], %s791_s29, %s791_s29, %s792_s30  }
  0x23   :  { %s749_s0 = scalar_lea.vmem %s62_s16, 2048  ;;  %p754_p2 = scmp.lt.s32.totalorder %s62_s16, %s62_s16 }
  0x24   :  { %p750_p1 = scmp.ne.s32.totalorder %s62_s16, %s749_s0  ;;  %p755_p3 = scmp.lt.s32.totalorder %s749_s0, %s749_s0 }
  0x26   :  { %p756_p4 = por %p755_p3, %p754_p2 }
  0x28   :  { %p757_p5 = pnand %p756_p4, %p750_p1 }
  0x2a   :  { %760 = shalt.err (!%p757_p5)
}
  0x2b   :  { %67 = dma.hbm_to_vmem [thread:$0]  %s936_s5, 2048, %s62_s16, [#allocation9], %s791_s29, %s791_s29, %s792_s30  }
  0x2c   :  { %781 = dma.done.wait [#allocation3], 384  }
  0x2d   :  { %782 = vsyncadd [#allocation3], 4294966912 }
  0x2e   :  { %783 = dma.done.wait [#allocation6], 2560  }
  0x2f   :  { %784 = vsyncadd [#allocation6], 4294964736 }
  0x30   :  { %785 = dma.done.wait [#allocation9], 2048  }
  0x31   :  { %786 = vsyncadd [#allocation9], 4294965248  ;;  %v795_v0 = vmov 0.0   ;;  %vm796_vm0 = vmmov 0   ;;  %v88_v1 = vld [vmem:[#allocation5 + $0x18] sm:$0xff]  ;;  %v87_v2 = vld [vmem:[#allocation5 + $0x10] sm:$0xff] }
  0x32   :  { %549 = vmatprep.subr.mxu0 %v795_v0  ;;  %557 = vmatprep.mubr.msk.f32.mxu0 %vm796_vm0, %v795_v0  ;;  %v86_v3 = vld [vmem:[#allocation5 + $0x8] sm:$0xff]  ;;  %v85_v4 = vld [vmem:[#allocation5] sm:$0xff]  ;;  %vm96_vm1 = vcmask 261120   ;;  %v83_v6 = vld [vmem:[#allocation2 + $0x8] sm:$0xff]  ;;  %s797_s23 = smov [#allocation10]  }
  0x33   :  { %566 = vmatprep.subr.mxu1 %v795_v0  ;;  %598 = vmatprep.mubr.msk.f32.mxu1 %vm796_vm0, %v795_v0  ;;  %v82_v5 = vld [vmem:[#allocation2] sm:$0xff]  ;;  %v84_v7 = vld [vmem:[#allocation2 + $0x10] sm:$0xff]  ;;  %v242_v9 = vld [vmem:[#allocation7 + $0x70] sm:$0xff]  ;;  %s484_s24 = sshll.u32 %s797_s23, 4  ;;  %s485_s24 = int_to_ptr.vmem [resolvable:$true] %s484_s24 }
  0x34   :  { %550 = vmatpush3.msra.mxu0 %v88_v1  ;;  %v243_v8 = vld [vmem:[#allocation7 + $0x78] sm:$0xff]  ;;  %v241_v10 = vld [vmem:[#allocation7 + $0x68] sm:$0xff]  ;;  %v240_v11 = vld [vmem:[#allocation7 + $0x60] sm:$0xff]  ;;  %s761_s25 = scalar_lea.vmem %s485_s24, 384  ;;  %p766_p7 = scmp.lt.s32.totalorder %s485_s24, %s485_s24 }
  0x35   :  { %551 = vmatprep.subr.mxu0 %v795_v0  ;;  %567 = vmatpush3.msra.mxu1 %v243_v8  ;;  %v239_v12 = vld [vmem:[#allocation7 + $0x58] sm:$0xff]  ;;  %v238_v13 = vld [vmem:[#allocation7 + $0x50] sm:$0xff]  ;;  %v237_v14 = vld [vmem:[#allocation7 + $0x48] sm:$0xff]  ;;  %p762_p6 = scmp.ne.s32.totalorder %s485_s24, %s761_s25  ;;  %p767_p8 = scmp.lt.s32.totalorder %s761_s25, %s761_s25 }
  0x36   :  { %552 = vmatpush3.msra.mxu0 %v87_v2  ;;  %568 = vmatprep.subr.mxu1 %v795_v0  ;;  %v236_v15 = vld [vmem:[#allocation7 + $0x40] sm:$0xff]  ;;  %v235_v16 = vld [vmem:[#allocation7 + $0x38] sm:$0xff]  ;;  %v234_v17 = vld [vmem:[#allocation7 + $0x30] sm:$0xff] }
  0x37   :  { %553 = vmatprep.subr.mxu0 %v795_v0  ;;  %569 = vmatpush3.msra.mxu1 %v242_v9  ;;  %v233_v18 = vld [vmem:[#allocation7 + $0x28] sm:$0xff]  ;;  %v232_v19 = vld [vmem:[#allocation7 + $0x20] sm:$0xff]  ;;  %v231_v20 = vld [vmem:[#allocation7 + $0x18] sm:$0xff]  ;;  %p768_p9 = por %p767_p8, %p766_p7 }
  0x38   :  { %554 = vmatpush3.msra.mxu0 %v86_v3  ;;  %570 = vmatprep.subr.mxu1 %v795_v0  ;;  %v230_v21 = vld [vmem:[#allocation7 + $0x10] sm:$0xff]  ;;  %v229_v22 = vld [vmem:[#allocation7 + $0x8] sm:$0xff]  ;;  %v228_v23 = vld [vmem:[#allocation7] sm:$0xff] }
  0x39   :  { %555 = vmatprep.subr.mxu0 %v795_v0  ;;  %571 = vmatpush3.msra.mxu1 %v241_v10  ;;  %v498_v24 = vld [vmem:[%s933_s2] ss:$0 sm:$0xff]  ;;  %v387_v8 = vld [vmem:[#allocation8 + $0x70] sm:$0xff]  ;;  %v385_v10 = vld [vmem:[#allocation8 + $0x60] sm:$0xff]  ;;  %p769_p10 = pnand %p768_p9, %p762_p6 }
  0x3a   :  { %556 = vmatpush3.msra.mxu0 %v85_v4  ;;  %572 = vmatprep.subr.mxu1 %v795_v0  ;;  %v386_v9 = vld [vmem:[#allocation8 + $0x68] sm:$0xff] }
  0x3b   :  { %558 = vmatmul.mubr.msk.f32.vlgmr.msra.gmra.mxu0 %vm96_vm1, %v82_v5  ;;  %607 = vmatprep.subr.mxu0 %v795_v0 }
  0x3c   :  { %560 = vmatprep.mubr.msk.f32.mxu0 %vm796_vm0, %v795_v0  ;;  %573 = vmatpush3.msra.mxu1 %v240_v11  ;;  %v384_v11 = vld [vmem:[#allocation8 + $0x58] sm:$0xff] }
  0x3d   :  { %574 = vmatprep.subr.mxu1 %v795_v0 }
  0x3e   :  { %575 = vmatpush3.msra.mxu1 %v239_v12  ;;  %v383_v12 = vld [vmem:[#allocation8 + $0x50] sm:$0xff] }
  0x3f   :  { %561 = vmatmul.mubr.msk.f32.gmra.mxu0 %vm96_vm1, %v83_v6  ;;  %576 = vmatprep.subr.mxu1 %v795_v0 }
  0x40   :  { %563 = vmatprep.mubr.msk.f32.mxu0 %vm796_vm0, %v795_v0  ;;  %577 = vmatpush3.msra.mxu1 %v238_v13  ;;  %v382_v13 = vld [vmem:[#allocation8 + $0x48] sm:$0xff] }
  0x41   :  { %578 = vmatprep.subr.mxu1 %v795_v0 }
  0x42   :  { %579 = vmatpush3.msra.mxu1 %v237_v14  ;;  %v381_v14 = vld [vmem:[#allocation8 + $0x40] sm:$0xff] }
  0x43   :  { %564 = vmatmul.mubr.msk.f32.gmra.mxu0 %vm96_vm1, %v84_v7  ;;  %580 = vmatprep.subr.mxu1 %v795_v0  ;;  %v388_v7 = vld [vmem:[#allocation8 + $0x78] sm:$0xff] }
  0x44   :  { %639 = vmatprep.mubr.msk.f32.mxu0 %vm796_vm0, %v795_v0  ;;  %581 = vmatpush3.msra.mxu1 %v236_v15  ;;  %v380_v15 = vld [vmem:[#allocation8 + $0x38] sm:$0xff] }
  0x45   :  { %582 = vmatprep.subr.mxu1 %v795_v0  ;;  %608 = vmatpush3.msra.mxu0 %v388_v7 }
  0x46   :  { %583 = vmatpush3.msra.mxu1 %v235_v16  ;;  %609 = vmatprep.subr.mxu0 %v795_v0  ;;  %v379_v16 = vld [vmem:[#allocation8 + $0x30] sm:$0xff] }
  0x47   :  { %584 = vmatprep.subr.mxu1 %v795_v0  ;;  %610 = vmatpush3.msra.mxu0 %v387_v8 }
  0x48   :  { %585 = vmatpush3.msra.mxu1 %v234_v17  ;;  %611 = vmatprep.subr.mxu0 %v795_v0  ;;  %v378_v17 = vld [vmem:[#allocation8 + $0x28] sm:$0xff] }
  0x49   :  { %586 = vmatprep.subr.mxu1 %v795_v0  ;;  %612 = vmatpush3.msra.mxu0 %v386_v9 }
  0x4a   :  { %587 = vmatpush3.msra.mxu1 %v233_v18  ;;  %613 = vmatprep.subr.mxu0 %v795_v0  ;;  %v377_v18 = vld [vmem:[#allocation8 + $0x20] sm:$0xff] }
  0x4b   :  { %588 = vmatprep.subr.mxu1 %v795_v0  ;;  %614 = vmatpush3.msra.mxu0 %v385_v10 }
  0x4c   :  { %589 = vmatpush3.msra.mxu1 %v232_v19  ;;  %615 = vmatprep.subr.mxu0 %v795_v0  ;;  %v376_v19 = vld [vmem:[#allocation8 + $0x18] sm:$0xff] }
  0x4d   :  { %590 = vmatprep.subr.mxu1 %v795_v0  ;;  %616 = vmatpush3.msra.mxu0 %v384_v11 }
  0x4e   :  { %591 = vmatpush3.msra.mxu1 %v231_v20  ;;  %617 = vmatprep.subr.mxu0 %v795_v0  ;;  %v375_v20 = vld [vmem:[#allocation8 + $0x10] sm:$0xff] }
  0x4f   :  { %592 = vmatprep.subr.mxu1 %v795_v0  ;;  %618 = vmatpush3.msra.mxu0 %v383_v12 }
  0x50   :  { %593 = vmatpush3.msra.mxu1 %v230_v21  ;;  %619 = vmatprep.subr.mxu0 %v795_v0  ;;  %v374_v21 = vld [vmem:[#allocation8 + $0x8] sm:$0xff] }
  0x51   :  { %594 = vmatprep.subr.mxu1 %v795_v0  ;;  %620 = vmatpush3.msra.mxu0 %v382_v13 }
  0x52   :  { %595 = vmatpush3.msra.mxu1 %v229_v22  ;;  %621 = vmatprep.subr.mxu0 %v795_v0  ;;  %v373_v22 = vld [vmem:[#allocation8] sm:$0xff] }
  0x53   :  { %596 = vmatprep.subr.mxu1 %v795_v0  ;;  %622 = vmatpush3.msra.mxu0 %v381_v14 }
  0x54   :  { %597 = vmatpush3.msra.mxu1 %v228_v23  ;;  %623 = vmatprep.subr.mxu0 %v795_v0  ;;  %v502_v23 = vld [vmem:[%s935_s4] ss:$0 sm:$0xff] }
  0x55   :  { %624 = vmatpush3.msra.mxu0 %v380_v15 }
  0x56   :  { %625 = vmatprep.subr.mxu0 %v795_v0 }
  0x57   :  { %626 = vmatpush3.msra.mxu0 %v379_v16 }
  0x58   :  { %627 = vmatprep.subr.mxu0 %v795_v0 }
  0x59   :  { %628 = vmatpush3.msra.mxu0 %v378_v17 }
  0x5a   :  { %629 = vmatprep.subr.mxu0 %v795_v0 }
  0x5b   :  { %630 = vmatpush3.msra.mxu0 %v377_v18 }
  0x5c   :  { %631 = vmatprep.subr.mxu0 %v795_v0 }
  0x5d   :  { %632 = vmatpush3.msra.mxu0 %v376_v19 }
  0x5e   :  { %633 = vmatprep.subr.mxu0 %v795_v0 }
  0x5f   :  { %634 = vmatpush3.msra.mxu0 %v375_v20 }
  0x60   :  { %635 = vmatprep.subr.mxu0 %v795_v0 }
  0x61   :  { %636 = vmatpush3.msra.mxu0 %v374_v21 }
  0x62   :  { %637 = vmatprep.subr.mxu0 %v795_v0 }
  0x63   :  { %638 = vmatpush3.msra.mxu0 %v373_v22 }
  0xfb   :  { %v172_v25 = vpop.f32.mrf.mxu0 }
  0xfc   :  { %v173_v26 = vadd.f32 %v498_v24, %v172_v25 }
  0xfd   :  { %v559_v27 = vpop.f32.mrf.mxu0 }
  0xfe   :  { %v189_v28 = vmin.f32 %v173_v26, 20.0  ;;  %vm186_vm3 = vcmp.gt.f32.partialorder %v173_v26, 20.0 }
  0xff   :  { %v177_v29 = vpop.f32.mrf.mxu0 }
 0x100   :  { %v192_v30 = vmul.f32 1.442695, %v189_v28  ;;  %v178_v31 = vadd.f32 %v498_v24, %v177_v29 }
 0x101   :  { %v562_v32 = vpop.f32.mrf.mxu0 }
 0x102   :  { %657 = vpow2.f32 %v192_v30  ;;  %v190_v33 = vmin.f32 %v178_v31, 20.0  ;;  %vm187_vm5 = vcmp.gt.f32.partialorder %v178_v31, 20.0 }
 0x103   :  { %v182_v34 = vpop.f32.mrf.mxu0 }
 0x104   :  { %v194_v35 = vmul.f32 1.442695, %v190_v33  ;;  %v183_v36 = vadd.f32 %v498_v24, %v182_v34 }
 0x105   :  { %v565_v37 = vpop.f32.mrf.mxu0 }
 0x106   :  { %659 = vpow2.f32 %v194_v35  ;;  %v191_v38 = vmin.f32 %v183_v36, 20.0  ;;  %vm188_vm7 = vcmp.gt.f32.partialorder %v183_v36, 20.0 }
 0x108   :  { %v196_v39 = vmul.f32 1.442695, %v191_v38 }
 0x10a   :  { %661 = vpow2.f32 %v196_v39 }
 0x10f   :  { %v658_v40 = vpop.eup %657 }
 0x110   :  { %v198_v41 = vadd.f32 1.0, %v658_v40  ;;  %v201_v45 = vmul.f32 -0.5, %v658_v40  ;;  %v204_v49 = vand.u32 2147483647, %v658_v40 }
 0x112   :  { %663 = vlog2.f32 %v198_v41  ;;  %v202_v47 = vadd.f32 1.0, %v201_v45  ;;  %vm205_vm2 = vcmp.lt.f32.partialorder %v204_v49, 0.0004427343 }
 0x113   :  { %v660_v42 = vpop.eup %659 }
 0x114   :  { %v207_v43 = vadd.f32 1.0, %v660_v42  ;;  %v210_v48 = vmul.f32 -0.5, %v660_v42  ;;  %v203_v52 = vmul.f32 %v658_v40, %v202_v47  ;;  %v213_v55 = vand.u32 2147483647, %v660_v42 }
 0x116   :  { %665 = vlog2.f32 %v207_v43  ;;  %v211_v53 = vadd.f32 1.0, %v210_v48  ;;  %vm214_vm4 = vcmp.lt.f32.partialorder %v213_v55, 0.0004427343 }
 0x117   :  { %v662_v44 = vpop.eup %661 }
 0x118   :  { %v216_v46 = vadd.f32 1.0, %v662_v44  ;;  %v219_v54 = vmul.f32 -0.5, %v662_v44  ;;  %v212_v60 = vmul.f32 %v660_v42, %v211_v53  ;;  %v222_v62 = vand.u32 2147483647, %v662_v44 }
 0x11a   :  { %667 = vlog2.f32 %v216_v46  ;;  %v220_v61 = vadd.f32 1.0, %v219_v54  ;;  %vm223_vm6 = vcmp.lt.f32.partialorder %v222_v62, 0.0004427343 }
 0x11c   :  { %v221_v4 = vmul.f32 %v662_v44, %v220_v61 }
 0x11f   :  { %v664_v50 = vpop.eup %663 }
 0x120   :  { %v200_v51 = vmul.f32 0.6931472, %v664_v50 }
 0x122   :  { %v206_v56 = vsel %vm205_vm2, %v203_v52, %v200_v51 }
 0x123   :  { %v666_v57 = vpop.eup %665  ;;  %v225_v58 = vsel %vm186_vm3, %v173_v26, %v206_v56 }
 0x124   :  { %599 = vmatmul.mubr.f32.vlgmr.msra.gmra.mxu1 %v225_v58  ;;  %v209_v59 = vmul.f32 0.6931472, %v666_v57 }
 0x125   :  { %601 = vmatprep.mubr.msk.f32.mxu1 %vm796_vm0, %v795_v0 }
 0x126   :  { %v215_v63 = vsel %vm214_vm4, %v212_v60, %v209_v59 }
 0x127   :  { %v668_v1 = vpop.eup %667  ;;  %v226_v2 = vsel %vm187_vm5, %v178_v31, %v215_v63 }
 0x128   :  { %602 = vmatmul.mubr.f32.gmra.mxu1 %v226_v2  ;;  %v218_v3 = vmul.f32 0.6931472, %v668_v1 }
 0x129   :  { %604 = vmatprep.mubr.msk.f32.mxu1 %vm796_vm0, %v795_v0 }
 0x12a   :  { %v224_v5 = vsel %vm223_vm6, %v221_v4, %v218_v3 }
 0x12b   :  { %v227_v6 = vsel %vm188_vm7, %v183_v36, %v224_v5 }
 0x12c   :  { %605 = vmatmul.mubr.f32.gmra.mxu1 %v227_v6  ;;  %v503_v6 = vld [vmem:[%s937_s6] ss:$0 sm:$0xff] }
 0x1e4   :  { %v317_v24 = vpop.f32.mrf.mxu1 }
 0x1e5   :  { %v318_v25 = vadd.f32 %v502_v23, %v317_v24 }
 0x1e6   :  { %v600_v26 = vpop.f32.mrf.mxu1 }
 0x1e7   :  { %v334_v27 = vmin.f32 %v318_v25, 20.0  ;;  %vm331_vm9 = vcmp.gt.f32.partialorder %v318_v25, 20.0 }
 0x1e8   :  { %v322_v28 = vpop.f32.mrf.mxu1 }
 0x1e9   :  { %v337_v29 = vmul.f32 1.442695, %v334_v27  ;;  %v323_v30 = vadd.f32 %v502_v23, %v322_v28 }
 0x1ea   :  { %v603_v31 = vpop.f32.mrf.mxu1 }
 0x1eb   :  { %669 = vpow2.f32 %v337_v29  ;;  %v335_v32 = vmin.f32 %v323_v30, 20.0  ;;  %vm332_vm11 = vcmp.gt.f32.partialorder %v323_v30, 20.0 }
 0x1ec   :  { %v327_v33 = vpop.f32.mrf.mxu1 }
 0x1ed   :  { %v339_v34 = vmul.f32 1.442695, %v335_v32  ;;  %v328_v35 = vadd.f32 %v502_v23, %v327_v33 }
 0x1ee   :  { %v606_v36 = vpop.f32.mrf.mxu1 }
 0x1ef   :  { %671 = vpow2.f32 %v339_v34  ;;  %v336_v37 = vmin.f32 %v328_v35, 20.0  ;;  %vm333_vm13 = vcmp.gt.f32.partialorder %v328_v35, 20.0 }
 0x1f1   :  { %v341_v38 = vmul.f32 1.442695, %v336_v37 }
 0x1f3   :  { %673 = vpow2.f32 %v341_v38 }
 0x1f8   :  { %v670_v39 = vpop.eup %669 }
 0x1f9   :  { %v343_v40 = vadd.f32 1.0, %v670_v39  ;;  %v346_v44 = vmul.f32 -0.5, %v670_v39  ;;  %v349_v48 = vand.u32 2147483647, %v670_v39 }
 0x1fb   :  { %675 = vlog2.f32 %v343_v40  ;;  %v347_v46 = vadd.f32 1.0, %v346_v44  ;;  %vm350_vm8 = vcmp.lt.f32.partialorder %v349_v48, 0.0004427343 }
 0x1fc   :  { %v672_v41 = vpop.eup %671 }
 0x1fd   :  { %v352_v42 = vadd.f32 1.0, %v672_v41  ;;  %v355_v47 = vmul.f32 -0.5, %v672_v41  ;;  %v348_v51 = vmul.f32 %v670_v39, %v347_v46  ;;  %v358_v54 = vand.u32 2147483647, %v672_v41 }
 0x1ff   :  { %677 = vlog2.f32 %v352_v42  ;;  %v356_v52 = vadd.f32 1.0, %v355_v47  ;;  %vm359_vm10 = vcmp.lt.f32.partialorder %v358_v54, 0.0004427343 }
 0x200   :  { %v674_v43 = vpop.eup %673 }
 0x201   :  { %v361_v45 = vadd.f32 1.0, %v674_v43  ;;  %v364_v53 = vmul.f32 -0.5, %v674_v43  ;;  %v357_v59 = vmul.f32 %v672_v41, %v356_v52  ;;  %v367_v61 = vand.u32 2147483647, %v674_v43 }
 0x203   :  { %679 = vlog2.f32 %v361_v45  ;;  %v365_v60 = vadd.f32 1.0, %v364_v53  ;;  %vm368_vm12 = vcmp.lt.f32.partialorder %v367_v61, 0.0004427343 }
 0x205   :  { %v366_v3 = vmul.f32 %v674_v43, %v365_v60 }
 0x208   :  { %v676_v49 = vpop.eup %675 }
 0x209   :  { %v345_v50 = vmul.f32 0.6931472, %v676_v49 }
 0x20b   :  { %v351_v55 = vsel %vm350_vm8, %v348_v51, %v345_v50 }
 0x20c   :  { %v678_v56 = vpop.eup %677  ;;  %v370_v57 = vsel %vm331_vm9, %v318_v25, %v351_v55 }
 0x20d   :  { %640 = vmatmul.mubr.f32.vlgmr.msra.gmra.mxu0 %v370_v57  ;;  %v354_v58 = vmul.f32 0.6931472, %v678_v56 }
 0x20e   :  { %642 = vmatprep.mubr.msk.f32.mxu0 %vm796_vm0, %v795_v0 }
 0x20f   :  { %v360_v62 = vsel %vm359_vm10, %v357_v59, %v354_v58 }
 0x210   :  { %v680_v63 = vpop.eup %679  ;;  %v371_v1 = vsel %vm332_vm11, %v323_v30, %v360_v62 }
 0x211   :  { %643 = vmatmul.mubr.f32.gmra.mxu0 %v371_v1  ;;  %v363_v2 = vmul.f32 0.6931472, %v680_v63 }
 0x212   :  { %645 = vmatprep.mubr.msk.f32.mxu0 %vm796_vm0, %v795_v0 }
 0x213   :  { %v369_v4 = vsel %vm368_vm12, %v366_v3, %v363_v2 }
 0x214   :  { %v372_v5 = vsel %vm333_vm13, %v328_v35, %v369_v4 }
 0x215   :  { %646 = vmatmul.mubr.f32.gmra.mxu0 %v372_v5 }
 0x2cd   :  { %v462_v7 = vpop.f32.mrf.mxu0 }
 0x2ce   :  { %v463_v8 = vadd.f32 %v503_v6, %v462_v7 }
 0x2cf   :  { %v641_v9 = vpop.f32.mrf.mxu0 }
 0x2d0   :  { %476 = vst [vmem:[#allocation10] sm:$0xff] %v463_v8 }
 0x2d1   :  { %v467_v10 = vpop.f32.mrf.mxu0 }
 0x2d2   :  { %v468_v11 = vadd.f32 %v503_v6, %v467_v10 }
 0x2d3   :  { %v644_v12 = vpop.f32.mrf.mxu0 }
 0x2d4   :  { %477 = vst [vmem:[#allocation10 + $0x8] sm:$0xff] %v468_v11 }
 0x2d5   :  { %v472_v0 = vpop.f32.mrf.mxu0 }
 0x2d6   :  { %v473_v13 = vadd.f32 %v503_v6, %v472_v0 }
 0x2d7   :  { %v647_v14 = vpop.f32.mrf.mxu0 }
 0x2d8   :  { %478 = vst [vmem:[#allocation10 + $0x10] sm:$0xff] %v473_v13 }
 0x2d9   :  { %772 = shalt.err (!%p769_p10)
}
 0x2da   :  { %490 = dma.vmem_to_hbm [thread:$0]  %s485_s24, 384, %s938_s7, [#allocation4], %s791_s29, %s791_s29, %s792_s30  }
 0x2db   :  { %787 = dma.done.wait [#allocation4], 384  }
 0x2dc   :  { %788 = vsyncadd [#allocation4], 4294966912 }
 0x2dd   :  { %494 = vsyncpa [#allocation3], 1 }
 0x2de   :  { %495 = vsyncpa [#allocation6], 1 }
 0x2df   :  { %496 = vsyncpa [#allocation9], 1 }
 0x2e0   :  { %497 = vsyncpa [#allocation4], 1 }

// kernel: tpu_custom_call.1
= control target key start
LH: loop header
LB: loop body
LE: loop exit
PB: predicated region body
PF: predicated region fallthrough
CT: control target
= control target key end

     0   :  { %12 = vsyncpa [#allocation3], 0  ;;  %s931_s0 = inlined_call_operand.hbm [shape: f32[24,32], index: 0, kind: input, shape index: {}]   ;;  %s932_s1 = inlined_call_operand.hbm [shape: f32[32,128], index: 1, kind: input, shape index: {}]   ;;  %s933_s2 = inlined_call_operand.vmem [shape: f32[1,128], index: 2, kind: input, shape index: {}]   ;;  %s934_s3 = inlined_call_operand.hbm [shape: f32[128,128], index: 3, kind: input, shape index: {}]   ;;  %s935_s4 = inlined_call_operand.vmem [shape: f32[1,128], index: 4, kind: input, shape index: {}]   ;;  %s936_s5 = inlined_call_operand.hbm [shape: f32[128,128], index: 5, kind: input, shape index: {}]   ;;  %s937_s6 = inlined_call_operand.vmem [shape: f32[1,128], index: 6, kind: input, shape index: {}]   ;;  %s938_s7 = inlined_call_operand.hbm [shape: f32[24,128], index: 7, kind: output, shape index: {}]  }
   0x1   :  { %13 = vsyncpa [#allocation6], 0 }
   0x2   :  { %14 = vsyncpa [#allocation9], 0 }
   0x3   :  { %15 = vsyncpa [#allocation4], 0  ;;  %s789_s24 = smov [#allocation5]   ;;  %s790_s26 = smov [#allocation2]  }
   0x4   :  { %s33_s25 = sshll.u32 %s789_s24, 4  ;;  %s21_s27 = sshll.u32 %s790_s26, 4  ;;  %s34_s25 = int_to_ptr.vmem [resolvable:$true] %s33_s25  ;;  %s22_s27 = int_to_ptr.vmem [resolvable:$true] %s21_s27 }
   0x5   :  { %s689_s28 = scalar_lea.vmem %s34_s25, 512  ;;  %p694_p1 = scmp.lt.s32.totalorder %s34_s25, %s34_s25 }
   0x6   :  { %p690_p0 = scmp.ne.s32.totalorder %s34_s25, %s689_s28  ;;  %p695_p2 = scmp.lt.s32.totalorder %s689_s28, %s689_s28 }
   0x8   :  { %p696_p3 = por %p695_p2, %p694_p1 }
   0xa   :  { %p697_p4 = pnand %p696_p3, %p690_p0 }
   0xc   :  { %700 = shalt.err (!%p697_p4)
}
   0xd   :  { %s791_s29 = smov 128   ;;  %s792_s30 = smov 8  }
   0xe   :  { %39 = dma.hbm_to_vmem [thread:$0]  %s932_s1, 512, %s34_s25, [#allocation6], %s791_s29, %s791_s29, %s792_s30  }
   0xf   :  { %s709_s10 = scalar_lea.vmem %s22_s27, 384  ;;  %p714_p6 = scmp.lt.s32.totalorder %s22_s27, %s22_s27 }
  0x10   :  { %p710_p5 = scmp.ne.s32.totalorder %s22_s27, %s709_s10  ;;  %p715_p7 = scmp.lt.s32.totalorder %s709_s10, %s709_s10 }
  0x12   :  { %p716_p8 = por %p715_p7, %p714_p6 }
  0x14   :  { %p717_p9 = pnand %p716_p8, %p710_p5 }
  0x16   :  { %720 = shalt.err (!%p717_p9)
}
  0x17   :  { %27 = dma.hbm_to_vmem [thread:$0]  %s931_s0, 384, %s22_s27, [#allocation3], %s791_s29, %s791_s29, %s792_s30  }
  0x18   :  { %s793_s13 = smov [#allocation7]   ;;  %s794_s15 = smov [#allocation8]  }
  0x19   :  { %s47_s14 = sshll.u32 %s793_s13, 4  ;;  %s61_s16 = sshll.u32 %s794_s15, 4  ;;  %s48_s14 = int_to_ptr.vmem [resolvable:$true] %s47_s14  ;;  %s62_s16 = int_to_ptr.vmem [resolvable:$true] %s61_s16 }
  0x1a   :  { %s729_s1 = scalar_lea.vmem %s48_s14, 2048  ;;  %p734_p11 = scmp.lt.s32.totalorder %s48_s14, %s48_s14 }
  0x1b   :  { %p730_p10 = scmp.ne.s32.totalorder %s48_s14, %s729_s1  ;;  %p735_p12 = scmp.lt.s32.totalorder %s729_s1, %s729_s1 }
  0x1d   :  { %p736_p13 = por %p735_p12, %p734_p11 }
  0x1f   :  { %p737_p0 = pnand %p736_p13, %p730_p10 }
  0x21   :  { %740 = shalt.err (!%p737_p0)
}
  0x22   :  { %53 = dma.hbm_to_vmem [thread:$0]  %s934_s3, 2048, %s48_s14, [#allocation6], %s791_s29, %s791_s29, %s792_s30  }
  0x23   :  { %s749_s0 = scalar_lea.vmem %s62_s16, 2048  ;;  %p754_p2 = scmp.lt.s32.totalorder %s62_s16, %s62_s16 }
  0x24   :  { %p750_p1 = scmp.ne.s32.totalorder %s62_s16, %s749_s0  ;;  %p755_p3 = scmp.lt.s32.totalorder %s749_s0, %s749_s0 }
  0x26   :  { %p756_p4 = por %p755_p3, %p754_p2 }
  0x28   :  { %p757_p5 = pnand %p756_p4, %p750_p1 }
  0x2a   :  { %760 = shalt.err (!%p757_p5)
}
  0x2b   :  { %67 = dma.hbm_to_vmem [thread:$0]  %s936_s5, 2048, %s62_s16, [#allocation9], %s791_s29, %s791_s29, %s792_s30  }
  0x2c   :  { %781 = dma.done.wait [#allocation3], 384  }
  0x2d   :  { %782 = vsyncadd [#allocation3], 4294966912 }
  0x2e   :  { %783 = dma.done.wait [#allocation6], 2560  }
  0x2f   :  { %784 = vsyncadd [#allocation6], 4294964736 }
  0x30   :  { %785 = dma.done.wait [#allocation9], 2048  }
  0x31   :  { %786 = vsyncadd [#allocation9], 4294965248  ;;  %v795_v0 = vmov 0.0   ;;  %vm796_vm0 = vmmov 0   ;;  %v88_v1 = vld [vmem:[#allocation5 + $0x18] sm:$0xff]  ;;  %v87_v2 = vld [vmem:[#allocation5 + $0x10] sm:$0xff] }
  0x32   :  { %549 = vmatprep.subr.mxu0 %v795_v0  ;;  %557 = vmatprep.mubr.msk.f32.mxu0 %vm796_vm0, %v795_v0  ;;  %v86_v3 = vld [vmem:[#allocation5 + $0x8] sm:$0xff]  ;;  %v85_v4 = vld [vmem:[#allocation5] sm:$0xff]  ;;  %vm96_vm1 = vcmask 261120   ;;  %v83_v6 = vld [vmem:[#allocation2 + $0x8] sm:$0xff]  ;;  %s797_s23 = smov [#allocation10]  }
  0x33   :  { %566 = vmatprep.subr.mxu1 %v795_v0  ;;  %598 = vmatprep.mubr.msk.f32.mxu1 %vm796_vm0, %v795_v0  ;;  %v82_v5 = vld [vmem:[#allocation2] sm:$0xff]  ;;  %v84_v7 = vld [vmem:[#allocation2 + $0x10] sm:$0xff]  ;;  %v242_v9 = vld [vmem:[#allocation7 + $0x70] sm:$0xff]  ;;  %s484_s24 = sshll.u32 %s797_s23, 4  ;;  %s485_s24 = int_to_ptr.vmem [resolvable:$true] %s484_s24 }
  0x34   :  { %550 = vmatpush3.msra.mxu0 %v88_v1  ;;  %v243_v8 = vld [vmem:[#allocation7 + $0x78] sm:$0xff]  ;;  %v241_v10 = vld [vmem:[#allocation7 + $0x68] sm:$0xff]  ;;  %v240_v11 = vld [vmem:[#allocation7 + $0x60] sm:$0xff]  ;;  %s761_s25 = scalar_lea.vmem %s485_s24, 384  ;;  %p766_p7 = scmp.lt.s32.totalorder %s485_s24, %s485_s24 }
  0x35   :  { %551 = vmatprep.subr.mxu0 %v795_v0  ;;  %567 = vmatpush3.msra.mxu1 %v243_v8  ;;  %v239_v12 = vld [vmem:[#allocation7 + $0x58] sm:$0xff]  ;;  %v238_v13 = vld [vmem:[#allocation7 + $0x50] sm:$0xff]  ;;  %v237_v14 = vld [vmem:[#allocation7 + $0x48] sm:$0xff]  ;;  %p762_p6 = scmp.ne.s32.totalorder %s485_s24, %s761_s25  ;;  %p767_p8 = scmp.lt.s32.totalorder %s761_s25, %s761_s25 }
  0x36   :  { %552 = vmatpush3.msra.mxu0 %v87_v2  ;;  %568 = vmatprep.subr.mxu1 %v795_v0  ;;  %v236_v15 = vld [vmem:[#allocation7 + $0x40] sm:$0xff]  ;;  %v235_v16 = vld [vmem:[#allocation7 + $0x38] sm:$0xff]  ;;  %v234_v17 = vld [vmem:[#allocation7 + $0x30] sm:$0xff] }
  0x37   :  { %553 = vmatprep.subr.mxu0 %v795_v0  ;;  %569 = vmatpush3.msra.mxu1 %v242_v9  ;;  %v233_v18 = vld [vmem:[#allocation7 + $0x28] sm:$0xff]  ;;  %v232_v19 = vld [vmem:[#allocation7 + $0x20] sm:$0xff]  ;;  %v231_v20 = vld [vmem:[#allocation7 + $0x18] sm:$0xff]  ;;  %p768_p9 = por %p767_p8, %p766_p7 }
  0x38   :  { %554 = vmatpush3.msra.mxu0 %v86_v3  ;;  %570 = vmatprep.subr.mxu1 %v795_v0  ;;  %v230_v21 = vld [vmem:[#allocation7 + $0x10] sm:$0xff]  ;;  %v229_v22 = vld [vmem:[#allocation7 + $0x8] sm:$0xff]  ;;  %v228_v23 = vld [vmem:[#allocation7] sm:$0xff] }
  0x39   :  { %555 = vmatprep.subr.mxu0 %v795_v0  ;;  %571 = vmatpush3.msra.mxu1 %v241_v10  ;;  %v498_v24 = vld [vmem:[%s933_s2] ss:$0 sm:$0xff]  ;;  %v387_v8 = vld [vmem:[#allocation8 + $0x70] sm:$0xff]  ;;  %v385_v10 = vld [vmem:[#allocation8 + $0x60] sm:$0xff]  ;;  %p769_p10 = pnand %p768_p9, %p762_p6 }
  0x3a   :  { %556 = vmatpush3.msra.mxu0 %v85_v4  ;;  %572 = vmatprep.subr.mxu1 %v795_v0  ;;  %v386_v9 = vld [vmem:[#allocation8 + $0x68] sm:$0xff] }
  0x3b   :  { %558 = vmatmul.mubr.msk.f32.vlgmr.msra.gmra.mxu0 %vm96_vm1, %v82_v5  ;;  %607 = vmatprep.subr.mxu0 %v795_v0 }
  0x3c   :  { %560 = vmatprep.mubr.msk.f32.mxu0 %vm796_vm0, %v795_v0  ;;  %573 = vmatpush3.msra.mxu1 %v240_v11  ;;  %v384_v11 = vld [vmem:[#allocation8 + $0x58] sm:$0xff] }
  0x3d   :  { %574 = vmatprep.subr.mxu1 %v795_v0 }
  0x3e   :  { %575 = vmatpush3.msra.mxu1 %v239_v12  ;;  %v383_v12 = vld [vmem:[#allocation8 + $0x50] sm:$0xff] }
  0x3f   :  { %561 = vmatmul.mubr.msk.f32.gmra.mxu0 %vm96_vm1, %v83_v6  ;;  %576 = vmatprep.subr.mxu1 %v795_v0 }
  0x40   :  { %563 = vmatprep.mubr.msk.f32.mxu0 %vm796_vm0, %v795_v0  ;;  %577 = vmatpush3.msra.mxu1 %v238_v13  ;;  %v382_v13 = vld [vmem:[#allocation8 + $0x48] sm:$0xff] }
  0x41   :  { %578 = vmatprep.subr.mxu1 %v795_v0 }
  0x42   :  { %579 = vmatpush3.msra.mxu1 %v237_v14  ;;  %v381_v14 = vld [vmem:[#allocation8 + $0x40] sm:$0xff] }
  0x43   :  { %564 = vmatmul.mubr.msk.f32.gmra.mxu0 %vm96_vm1, %v84_v7  ;;  %580 = vmatprep.subr.mxu1 %v795_v0  ;;  %v388_v7 = vld [vmem:[#allocation8 + $0x78] sm:$0xff] }
  0x44   :  { %639 = vmatprep.mubr.msk.f32.mxu0 %vm796_vm0, %v795_v0  ;;  %581 = vmatpush3.msra.mxu1 %v236_v15  ;;  %v380_v15 = vld [vmem:[#allocation8 + $0x38] sm:$0xff] }
  0x45   :  { %582 = vmatprep.subr.mxu1 %v795_v0  ;;  %608 = vmatpush3.msra.mxu0 %v388_v7 }
  0x46   :  { %583 = vmatpush3.msra.mxu1 %v235_v16  ;;  %609 = vmatprep.subr.mxu0 %v795_v0  ;;  %v379_v16 = vld [vmem:[#allocation8 + $0x30] sm:$0xff] }
  0x47   :  { %584 = vmatprep.subr.mxu1 %v795_v0  ;;  %610 = vmatpush3.msra.mxu0 %v387_v8 }
  0x48   :  { %585 = vmatpush3.msra.mxu1 %v234_v17  ;;  %611 = vmatprep.subr.mxu0 %v795_v0  ;;  %v378_v17 = vld [vmem:[#allocation8 + $0x28] sm:$0xff] }
  0x49   :  { %586 = vmatprep.subr.mxu1 %v795_v0  ;;  %612 = vmatpush3.msra.mxu0 %v386_v9 }
  0x4a   :  { %587 = vmatpush3.msra.mxu1 %v233_v18  ;;  %613 = vmatprep.subr.mxu0 %v795_v0  ;;  %v377_v18 = vld [vmem:[#allocation8 + $0x20] sm:$0xff] }
  0x4b   :  { %588 = vmatprep.subr.mxu1 %v795_v0  ;;  %614 = vmatpush3.msra.mxu0 %v385_v10 }
  0x4c   :  { %589 = vmatpush3.msra.mxu1 %v232_v19  ;;  %615 = vmatprep.subr.mxu0 %v795_v0  ;;  %v376_v19 = vld [vmem:[#allocation8 + $0x18] sm:$0xff] }
  0x4d   :  { %590 = vmatprep.subr.mxu1 %v795_v0  ;;  %616 = vmatpush3.msra.mxu0 %v384_v11 }
  0x4e   :  { %591 = vmatpush3.msra.mxu1 %v231_v20  ;;  %617 = vmatprep.subr.mxu0 %v795_v0  ;;  %v375_v20 = vld [vmem:[#allocation8 + $0x10] sm:$0xff] }
  0x4f   :  { %592 = vmatprep.subr.mxu1 %v795_v0  ;;  %618 = vmatpush3.msra.mxu0 %v383_v12 }
  0x50   :  { %593 = vmatpush3.msra.mxu1 %v230_v21  ;;  %619 = vmatprep.subr.mxu0 %v795_v0  ;;  %v374_v21 = vld [vmem:[#allocation8 + $0x8] sm:$0xff] }
  0x51   :  { %594 = vmatprep.subr.mxu1 %v795_v0  ;;  %620 = vmatpush3.msra.mxu0 %v382_v13 }
  0x52   :  { %595 = vmatpush3.msra.mxu1 %v229_v22  ;;  %621 = vmatprep.subr.mxu0 %v795_v0  ;;  %v373_v22 = vld [vmem:[#allocation8] sm:$0xff] }
  0x53   :  { %596 = vmatprep.subr.mxu1 %v795_v0  ;;  %622 = vmatpush3.msra.mxu0 %v381_v14 }
  0x54   :  { %597 = vmatpush3.msra.mxu1 %v228_v23  ;;  %623 = vmatprep.subr.mxu0 %v795_v0  ;;  %v502_v23 = vld [vmem:[%s935_s4] ss:$0 sm:$0xff] }
  0x55   :  { %624 = vmatpush3.msra.mxu0 %v380_v15 }
  0x56   :  { %625 = vmatprep.subr.mxu0 %v795_v0 }
  0x57   :  { %626 = vmatpush3.msra.mxu0 %v379_v16 }
  0x58   :  { %627 = vmatprep.subr.mxu0 %v795_v0 }
  0x59   :  { %628 = vmatpush3.msra.mxu0 %v378_v17 }
  0x5a   :  { %629 = vmatprep.subr.mxu0 %v795_v0 }
  0x5b   :  { %630 = vmatpush3.msra.mxu0 %v377_v18 }
  0x5c   :  { %631 = vmatprep.subr.mxu0 %v795_v0 }
  0x5d   :  { %632 = vmatpush3.msra.mxu0 %v376_v19 }
  0x5e   :  { %633 = vmatprep.subr.mxu0 %v795_v0 }
  0x5f   :  { %634 = vmatpush3.msra.mxu0 %v375_v20 }
  0x60   :  { %635 = vmatprep.subr.mxu0 %v795_v0 }
  0x61   :  { %636 = vmatpush3.msra.mxu0 %v374_v21 }
  0x62   :  { %637 = vmatprep.subr.mxu0 %v795_v0 }
  0x63   :  { %638 = vmatpush3.msra.mxu0 %v373_v22 }
  0xfb   :  { %v172_v25 = vpop.f32.mrf.mxu0 }
  0xfc   :  { %v173_v26 = vadd.f32 %v498_v24, %v172_v25 }
  0xfd   :  { %v559_v27 = vpop.f32.mrf.mxu0 }
  0xfe   :  { %v189_v28 = vmin.f32 %v173_v26, 20.0  ;;  %vm186_vm3 = vcmp.gt.f32.partialorder %v173_v26, 20.0 }
  0xff   :  { %v177_v29 = vpop.f32.mrf.mxu0 }
 0x100   :  { %v192_v30 = vmul.f32 1.442695, %v189_v28  ;;  %v178_v31 = vadd.f32 %v498_v24, %v177_v29 }
 0x101   :  { %v562_v32 = vpop.f32.mrf.mxu0 }
 0x102   :  { %657 = vpow2.f32 %v192_v30  ;;  %v190_v33 = vmin.f32 %v178_v31, 20.0  ;;  %vm187_vm5 = vcmp.gt.f32.partialorder %v178_v31, 20.0 }
 0x103   :  { %v182_v34 = vpop.f32.mrf.mxu0 }
 0x104   :  { %v194_v35 = vmul.f32 1.442695, %v190_v33  ;;  %v183_v36 = vadd.f32 %v498_v24, %v182_v34 }
 0x105   :  { %v565_v37 = vpop.f32.mrf.mxu0 }
 0x106   :  { %659 = vpow2.f32 %v194_v35  ;;  %v191_v38 = vmin.f32 %v183_v36, 20.0  ;;  %vm188_vm7 = vcmp.gt.f32.partialorder %v183_v36, 20.0 }
 0x108   :  { %v196_v39 = vmul.f32 1.442695, %v191_v38 }
 0x10a   :  { %661 = vpow2.f32 %v196_v39 }
 0x10f   :  { %v658_v40 = vpop.eup %657 }
 0x110   :  { %v198_v41 = vadd.f32 1.0, %v658_v40  ;;  %v201_v45 = vmul.f32 -0.5, %v658_v40  ;;  %v204_v49 = vand.u32 2147483647, %v658_v40 }
 0x112   :  { %663 = vlog2.f32 %v198_v41  ;;  %v202_v47 = vadd.f32 1.0, %v201_v45  ;;  %vm205_vm2 = vcmp.lt.f32.partialorder %v204_v49, 0.0004427343 }
 0x113   :  { %v660_v42 = vpop.eup %659 }
 0x114   :  { %v207_v43 = vadd.f32 1.0, %v660_v42  ;;  %v210_v48 = vmul.f32 -0.5, %v660_v42  ;;  %v203_v52 = vmul.f32 %v658_v40, %v202_v47  ;;  %v213_v55 = vand.u32 2147483647, %v660_v42 }
 0x116   :  { %665 = vlog2.f32 %v207_v43  ;;  %v211_v53 = vadd.f32 1.0, %v210_v48  ;;  %vm214_vm4 = vcmp.lt.f32.partialorder %v213_v55, 0.0004427343 }
 0x117   :  { %v662_v44 = vpop.eup %661 }
 0x118   :  { %v216_v46 = vadd.f32 1.0, %v662_v44  ;;  %v219_v54 = vmul.f32 -0.5, %v662_v44  ;;  %v212_v60 = vmul.f32 %v660_v42, %v211_v53  ;;  %v222_v62 = vand.u32 2147483647, %v662_v44 }
 0x11a   :  { %667 = vlog2.f32 %v216_v46  ;;  %v220_v61 = vadd.f32 1.0, %v219_v54  ;;  %vm223_vm6 = vcmp.lt.f32.partialorder %v222_v62, 0.0004427343 }
 0x11c   :  { %v221_v4 = vmul.f32 %v662_v44, %v220_v61 }
 0x11f   :  { %v664_v50 = vpop.eup %663 }
 0x120   :  { %v200_v51 = vmul.f32 0.6931472, %v664_v50 }
 0x122   :  { %v206_v56 = vsel %vm205_vm2, %v203_v52, %v200_v51 }
 0x123   :  { %v666_v57 = vpop.eup %665  ;;  %v225_v58 = vsel %vm186_vm3, %v173_v26, %v206_v56 }
 0x124   :  { %599 = vmatmul.mubr.f32.vlgmr.msra.gmra.mxu1 %v225_v58  ;;  %v209_v59 = vmul.f32 0.6931472, %v666_v57 }
 0x125   :  { %601 = vmatprep.mubr.msk.f32.mxu1 %vm796_vm0, %v795_v0 }
 0x126   :  { %v215_v63 = vsel %vm214_vm4, %v212_v60, %v209_v59 }
 0x127   :  { %v668_v1 = vpop.eup %667  ;;  %v226_v2 = vsel %vm187_vm5, %v178_v31, %v215_v63 }
 0x128   :  { %602 = vmatmul.mubr.f32.gmra.mxu1 %v226_v2  ;;  %v218_v3 = vmul.f32 0.6931472, %v668_v1 }
 0x129   :  { %604 = vmatprep.mubr.msk.f32.mxu1 %vm796_vm0, %v795_v0 }
 0x12a   :  { %v224_v5 = vsel %vm223_vm6, %v221_v4, %v218_v3 }
 0x12b   :  { %v227_v6 = vsel %vm188_vm7, %v183_v36, %v224_v5 }
 0x12c   :  { %605 = vmatmul.mubr.f32.gmra.mxu1 %v227_v6  ;;  %v503_v6 = vld [vmem:[%s937_s6] ss:$0 sm:$0xff] }
 0x1e4   :  { %v317_v24 = vpop.f32.mrf.mxu1 }
 0x1e5   :  { %v318_v25 = vadd.f32 %v502_v23, %v317_v24 }
 0x1e6   :  { %v600_v26 = vpop.f32.mrf.mxu1 }
 0x1e7   :  { %v334_v27 = vmin.f32 %v318_v25, 20.0  ;;  %vm331_vm9 = vcmp.gt.f32.partialorder %v318_v25, 20.0 }
 0x1e8   :  { %v322_v28 = vpop.f32.mrf.mxu1 }
 0x1e9   :  { %v337_v29 = vmul.f32 1.442695, %v334_v27  ;;  %v323_v30 = vadd.f32 %v502_v23, %v322_v28 }
 0x1ea   :  { %v603_v31 = vpop.f32.mrf.mxu1 }
 0x1eb   :  { %669 = vpow2.f32 %v337_v29  ;;  %v335_v32 = vmin.f32 %v323_v30, 20.0  ;;  %vm332_vm11 = vcmp.gt.f32.partialorder %v323_v30, 20.0 }
 0x1ec   :  { %v327_v33 = vpop.f32.mrf.mxu1 }
 0x1ed   :  { %v339_v34 = vmul.f32 1.442695, %v335_v32  ;;  %v328_v35 = vadd.f32 %v502_v23, %v327_v33 }
 0x1ee   :  { %v606_v36 = vpop.f32.mrf.mxu1 }
 0x1ef   :  { %671 = vpow2.f32 %v339_v34  ;;  %v336_v37 = vmin.f32 %v328_v35, 20.0  ;;  %vm333_vm13 = vcmp.gt.f32.partialorder %v328_v35, 20.0 }
 0x1f1   :  { %v341_v38 = vmul.f32 1.442695, %v336_v37 }
 0x1f3   :  { %673 = vpow2.f32 %v341_v38 }
 0x1f8   :  { %v670_v39 = vpop.eup %669 }
 0x1f9   :  { %v343_v40 = vadd.f32 1.0, %v670_v39  ;;  %v346_v44 = vmul.f32 -0.5, %v670_v39  ;;  %v349_v48 = vand.u32 2147483647, %v670_v39 }
 0x1fb   :  { %675 = vlog2.f32 %v343_v40  ;;  %v347_v46 = vadd.f32 1.0, %v346_v44  ;;  %vm350_vm8 = vcmp.lt.f32.partialorder %v349_v48, 0.0004427343 }
 0x1fc   :  { %v672_v41 = vpop.eup %671 }
 0x1fd   :  { %v352_v42 = vadd.f32 1.0, %v672_v41  ;;  %v355_v47 = vmul.f32 -0.5, %v672_v41  ;;  %v348_v51 = vmul.f32 %v670_v39, %v347_v46  ;;  %v358_v54 = vand.u32 2147483647, %v672_v41 }
 0x1ff   :  { %677 = vlog2.f32 %v352_v42  ;;  %v356_v52 = vadd.f32 1.0, %v355_v47  ;;  %vm359_vm10 = vcmp.lt.f32.partialorder %v358_v54, 0.0004427343 }
 0x200   :  { %v674_v43 = vpop.eup %673 }
 0x201   :  { %v361_v45 = vadd.f32 1.0, %v674_v43  ;;  %v364_v53 = vmul.f32 -0.5, %v674_v43  ;;  %v357_v59 = vmul.f32 %v672_v41, %v356_v52  ;;  %v367_v61 = vand.u32 2147483647, %v674_v43 }
 0x203   :  { %679 = vlog2.f32 %v361_v45  ;;  %v365_v60 = vadd.f32 1.0, %v364_v53  ;;  %vm368_vm12 = vcmp.lt.f32.partialorder %v367_v61, 0.0004427343 }
 0x205   :  { %v366_v3 = vmul.f32 %v674_v43, %v365_v60 }
 0x208   :  { %v676_v49 = vpop.eup %675 }
 0x209   :  { %v345_v50 = vmul.f32 0.6931472, %v676_v49 }
 0x20b   :  { %v351_v55 = vsel %vm350_vm8, %v348_v51, %v345_v50 }
 0x20c   :  { %v678_v56 = vpop.eup %677  ;;  %v370_v57 = vsel %vm331_vm9, %v318_v25, %v351_v55 }
 0x20d   :  { %640 = vmatmul.mubr.f32.vlgmr.msra.gmra.mxu0 %v370_v57  ;;  %v354_v58 = vmul.f32 0.6931472, %v678_v56 }
 0x20e   :  { %642 = vmatprep.mubr.msk.f32.mxu0 %vm796_vm0, %v795_v0 }
 0x20f   :  { %v360_v62 = vsel %vm359_vm10, %v357_v59, %v354_v58 }
 0x210   :  { %v680_v63 = vpop.eup %679  ;;  %v371_v1 = vsel %vm332_vm11, %v323_v30, %v360_v62 }
 0x211   :  { %643 = vmatmul.mubr.f32.gmra.mxu0 %v371_v1  ;;  %v363_v2 = vmul.f32 0.6931472, %v680_v63 }
 0x212   :  { %645 = vmatprep.mubr.msk.f32.mxu0 %vm796_vm0, %v795_v0 }
 0x213   :  { %v369_v4 = vsel %vm368_vm12, %v366_v3, %v363_v2 }
 0x214   :  { %v372_v5 = vsel %vm333_vm13, %v328_v35, %v369_v4 }
 0x215   :  { %646 = vmatmul.mubr.f32.gmra.mxu0 %v372_v5 }
 0x2cd   :  { %v462_v7 = vpop.f32.mrf.mxu0 }
 0x2ce   :  { %v463_v8 = vadd.f32 %v503_v6, %v462_v7 }
 0x2cf   :  { %v641_v9 = vpop.f32.mrf.mxu0 }
 0x2d0   :  { %476 = vst [vmem:[#allocation10] sm:$0xff] %v463_v8 }
 0x2d1   :  { %v467_v10 = vpop.f32.mrf.mxu0 }
 0x2d2   :  { %v468_v11 = vadd.f32 %v503_v6, %v467_v10 }
 0x2d3   :  { %v644_v12 = vpop.f32.mrf.mxu0 }
 0x2d4   :  { %477 = vst [vmem:[#allocation10 + $0x8] sm:$0xff] %v468_v11 }
 0x2d5   :  { %v472_v0 = vpop.f32.mrf.mxu0 }
 0x2d6   :  { %v473_v13 = vadd.f32 %v503_v6, %v472_v0 }
 0x2d7   :  { %v647_v14 = vpop.f32.mrf.mxu0 }
 0x2d8   :  { %478 = vst [vmem:[#allocation10 + $0x10] sm:$0xff] %v473_v13 }
 0x2d9   :  { %772 = shalt.err (!%p769_p10)
}
 0x2da   :  { %490 = dma.vmem_to_hbm [thread:$0]  %s485_s24, 384, %s938_s7, [#allocation4], %s791_s29, %s791_s29, %s792_s30  }
 0x2db   :  { %787 = dma.done.wait [#allocation4], 384  }
 0x2dc   :  { %788 = vsyncadd [#allocation4], 4294966912 }
 0x2dd   :  { %494 = vsyncpa [#allocation3], 1 }
 0x2de   :  { %495 = vsyncpa [#allocation6], 1 }
 0x2df   :  { %496 = vsyncpa [#allocation9], 1 }
 0x2e0   :  { %497 = vsyncpa [#allocation4], 1 }

</bundles_post_ra>
